<compile_context>
chip_gen: v7x
topology: tpu7x:2x2x1
jax: 0.10.0
libtpu: 0.0.40
codegen_flags: <defaults>
</compile_context>

<pallas_src>
import jax
import jax.numpy as jnp
from jax.experimental import pallas as pl
from jax.experimental.pallas import tpu as pltpu

SEQ = 10      # fixed sequence length (position_ids = arange(10))
HID = 768     # hidden size
EPS = 1e-12   # layernorm epsilon (TF-style, inside the sqrt)


def pos_emb_ln_kernel(words_ref, pos_ref, gamma_ref, beta_ref, out_ref):
    """Add position embeddings + BertLayerNorm over the hidden dim.

    words_ref : (TILE_B, SEQ, HID)  TILE_B batch rows of word embeddings
    pos_ref   : (SEQ, HID)          position embedding table (resident)
    gamma_ref : (1, HID)            layernorm scale (resident)
    beta_ref  : (1, HID)            layernorm bias  (resident)
    out_ref   : (TILE_B, SEQ, HID)
    """
    # Cast to f32 *before* the add so bf16 inputs would not lose precision.
    x = (words_ref[...].astype(jnp.float32)
         + pos_ref[...][None, :, :].astype(jnp.float32))      # (TILE_B, SEQ, HID)

    u = jnp.mean(x, axis=-1, keepdims=True)                   # (TILE_B, SEQ, 1)
    d = x - u
    s = jnp.mean(d * d, axis=-1, keepdims=True)               # biased variance
    normed = d * jax.lax.rsqrt(s + EPS)                        # rsqrt -> EUP slot

    gamma = gamma_ref[...][None, :, :].astype(jnp.float32)     # (1, 1, HID)
    beta = beta_ref[...][None, :, :].astype(jnp.float32)
    out_ref[...] = (gamma * normed + beta).astype(out_ref.dtype)
    # TODO(synk): dropout(p=0.1) is identity at inference; training-mode RNG
    # masking is not reproduced here.


def position_embeddings_forward(words_embeddings, pos_table, ln_weight, ln_bias,
                                *, tile_b=64):
    """words_embeddings: (B, SEQ, HID). Output in the same dtype as the input
    (keep f32 unless the downstream consumer's numerics contract allows bf16)."""
    B, S, H = words_embeddings.shape
    assert S == SEQ and H == HID

    gamma = ln_weight.reshape(1, HID)
    beta = ln_bias.reshape(1, HID)

    # --- TILE_B selection ---------------------------------------------------
    # Each buffered in/out block pads SEQ 10->16 sublanes: TILE_B * 16*768*4 B.
    # TILE_B=64 => ~3 MiB/block, ~12 MiB with in+out double-buffered: safe on
    # v5e/v6e/v7x without raising vmem_limit_bytes. (v6e could push 256+ with
    # a larger vmem_limit_bytes, but 64 rows already saturate HBM bandwidth.)
    tile_b = max(1, min(tile_b, B))
    # Keep >= 2 grid steps once B is big enough to matter, so both v7x
    # TensorCores get work (dimension_semantics=("parallel",)).
    if B >= 64 and pl.cdiv(B, tile_b) < 2:
        tile_b = pl.cdiv(B, 2)
    grid = (pl.cdiv(B, tile_b),)

    return pl.pallas_call(
        pos_emb_ln_kernel,
        out_shape=jax.ShapeDtypeStruct((B, SEQ, HID), words_embeddings.dtype),
        grid_spec=pltpu.PrefetchScalarGridSpec(
            num_scalar_prefetch=0,
            grid=grid,
            in_specs=[
                # TILE_B rows of word embeddings per step.
                pl.BlockSpec((tile_b, SEQ, HID), lambda b: (b, 0, 0)),
                # Grid-invariant residents: same block index every step, so
                # Pallas does not re-DMA them (do NOT pre-tile in the wrapper).
                pl.BlockSpec((SEQ, HID), lambda b: (0, 0)),
                pl.BlockSpec((1, HID), lambda b: (0, 0)),
                pl.BlockSpec((1, HID), lambda b: (0, 0)),
            ],
            out_specs=pl.BlockSpec((tile_b, SEQ, HID), lambda b: (b, 0, 0)),
        ),
        compiler_params=pltpu.CompilerParams(
            dimension_semantics=("parallel",)),
    )(words_embeddings, pos_table, gamma, beta)


if __name__ == "__main__":
    key = jax.random.PRNGKey(0)
    k_words, k_pos = jax.random.split(key)

    B = 4
    # Inputs: word embeddings, shape (B, 10, 768)
    words = jax.random.normal(k_words, (B, SEQ, HID), dtype=jnp.float32)

    # Parameters (deterministic init, matching PyTorch shapes):
    #   nn.Embedding(10, 768).weight ~ N(0, 1)
    pos_table = jax.random.normal(k_pos, (SEQ, HID), dtype=jnp.float32)
    #   BertLayerNorm: weight = ones(768), bias = zeros(768)
    ln_weight = jnp.ones((HID,), dtype=jnp.float32)
    ln_bias = jnp.zeros((HID,), dtype=jnp.float32)

    # Pure-JAX reference (exactly the BertLayerNorm forward math).
    x = words + pos_table[None, :, :]
    u = jnp.mean(x, axis=-1, keepdims=True)
    s = jnp.mean((x - u) ** 2, axis=-1, keepdims=True)
    ref = ln_weight * ((x - u) / jnp.sqrt(s + EPS)) + ln_bias

    # Run 1: default tiling (all rows in one block here, grid=(1,)).
    out = position_embeddings_forward(words, pos_table, ln_weight, ln_bias)
    jax.block_until_ready(out)
    assert jnp.allclose(out, ref, atol=1e-5, rtol=1e-5), "mismatch vs reference"

    # Run 2: force a multi-step grid (tile_b=2 -> grid=(2,)) to exercise the
    # batched-block path with resident pos/gamma/beta across steps.
    out2 = position_embeddings_forward(words, pos_table, ln_weight, ln_bias,
                                       tile_b=2)
    jax.block_until_ready(out2)
    assert jnp.allclose(out2, ref, atol=1e-5, rtol=1e-5), "mismatch (tiled) vs reference"

    print("KERNEL_OK")
</pallas_src>

<mosaic_0001>
module attributes {stable_mosaic.version = 11 : i64} {
  func.func @pos_emb_ln_kernel(%arg0: i32, %arg1: memref<4x10x768xf32, #tpu.memory_space<vmem>>, %arg2: memref<10x768xf32, #tpu.memory_space<vmem>>, %arg3: memref<1x768xf32, #tpu.memory_space<vmem>>, %arg4: memref<1x768xf32, #tpu.memory_space<vmem>>, %arg5: memref<4x10x768xf32, #tpu.memory_space<vmem>>) attributes {dimension_semantics = [#tpu.dimension_semantics<parallel>], iteration_bounds = array<i64: 1>, scalar_prefetch = 0 : i64, scratch_operands = 0 : i64, tpu.core_type = #tpu.core_type<tc>, window_params = [{transform_indices = @transform_0, window_bounds = array<i64: 4, 10, 768>}, {pipeline_mode = #tpu.pipeline_mode<synchronous>, transform_indices = @transform_1, window_bounds = array<i64: 10, 768>}, {pipeline_mode = #tpu.pipeline_mode<synchronous>, transform_indices = @transform_2, window_bounds = array<i64: 1, 768>}, {pipeline_mode = #tpu.pipeline_mode<synchronous>, transform_indices = @transform_3, window_bounds = array<i64: 1, 768>}, {transform_indices = @transform_4, window_bounds = array<i64: 4, 10, 768>}]} {
    %c0 = arith.constant 0 : index
    %c0_0 = arith.constant 0 : index
    %c0_1 = arith.constant 0 : index
    %0 = vector.load %arg1[%c0, %c0_0, %c0_1] : memref<4x10x768xf32, #tpu.memory_space<vmem>>, vector<4x10x768xf32>
    %c0_2 = arith.constant 0 : index
    %c0_3 = arith.constant 0 : index
    %1 = vector.load %arg2[%c0_2, %c0_3] : memref<10x768xf32, #tpu.memory_space<vmem>>, vector<10x768xf32>
    %2 = vector.shape_cast %1 : vector<10x768xf32> to vector<1x10x768xf32>
    %3 = vector.broadcast %2 : vector<1x10x768xf32> to vector<4x10x768xf32>
    %4 = arith.addf %0, %3 : vector<4x10x768xf32>
    %cst = arith.constant dense<0.000000e+00> : vector<4x10xf32>
    %5 = vector.multi_reduction <add>, %4, %cst [2] : vector<4x10x768xf32> to vector<4x10xf32>
    %6 = vector.shape_cast %5 : vector<4x10xf32> to vector<4x10x1xf32>
    %cst_4 = arith.constant 7.680000e+02 : f32
    %7 = vector.broadcast %cst_4 : f32 to vector<4x10x1xf32>
    %8 = arith.divf %6, %7 : vector<4x10x1xf32>
    %9 = vector.broadcast %8 : vector<4x10x1xf32> to vector<4x10x768xf32>
    %10 = arith.subf %4, %9 : vector<4x10x768xf32>
    %11 = arith.mulf %10, %10 : vector<4x10x768xf32>
    %cst_5 = arith.constant dense<0.000000e+00> : vector<4x10xf32>
    %12 = vector.multi_reduction <add>, %11, %cst_5 [2] : vector<4x10x768xf32> to vector<4x10xf32>
    %13 = vector.shape_cast %12 : vector<4x10xf32> to vector<4x10x1xf32>
    %cst_6 = arith.constant 7.680000e+02 : f32
    %14 = vector.broadcast %cst_6 : f32 to vector<4x10x1xf32>
    %15 = arith.divf %13, %14 : vector<4x10x1xf32>
    %cst_7 = arith.constant 9.99999996E-13 : f32
    %16 = vector.broadcast %cst_7 : f32 to vector<4x10x1xf32>
    %17 = arith.addf %15, %16 : vector<4x10x1xf32>
    %18 = math.rsqrt %17 : vector<4x10x1xf32>
    %19 = vector.broadcast %18 : vector<4x10x1xf32> to vector<4x10x768xf32>
    %20 = arith.mulf %10, %19 : vector<4x10x768xf32>
    %c0_8 = arith.constant 0 : index
    %c0_9 = arith.constant 0 : index
    %21 = vector.load %arg3[%c0_8, %c0_9] : memref<1x768xf32, #tpu.memory_space<vmem>>, vector<1x768xf32>
    %22 = vector.shape_cast %21 : vector<1x768xf32> to vector<1x1x768xf32>
    %c0_10 = arith.constant 0 : index
    %c0_11 = arith.constant 0 : index
    %23 = vector.load %arg4[%c0_10, %c0_11] : memref<1x768xf32, #tpu.memory_space<vmem>>, vector<1x768xf32>
    %24 = vector.shape_cast %23 : vector<1x768xf32> to vector<1x1x768xf32>
    %25 = vector.broadcast %22 : vector<1x1x768xf32> to vector<4x10x768xf32>
    %26 = arith.mulf %25, %20 : vector<4x10x768xf32>
    %27 = vector.broadcast %24 : vector<1x1x768xf32> to vector<4x10x768xf32>
    %28 = arith.addf %26, %27 : vector<4x10x768xf32>
    %c0_12 = arith.constant 0 : index
    %c0_13 = arith.constant 0 : index
    %c0_14 = arith.constant 0 : index
    %29 = vector.load %arg5[%c0_12, %c0_13, %c0_14] : memref<4x10x768xf32, #tpu.memory_space<vmem>>, vector<4x10x768xf32>
    tpu.vector_store %arg5[%c0_12, %c0_13, %c0_14], %28 {strides = array<i32>} : memref<4x10x768xf32, #tpu.memory_space<vmem>>, vector<4x10x768xf32>,
    return
  }
  func.func @transform_0(%arg0: i32) -> (i32, i32, i32) {
    %c0_i32 = arith.constant 0 : i32
    %c0_i32_0 = arith.constant 0 : i32
    %c0_i32_1 = arith.constant 0 : i32
    return %arg0, %c0_i32, %c0_i32_0 : i32, i32, i32
  }
  func.func @transform_1(%arg0: i32) -> (i32, i32) {
    %c0_i32 = arith.constant 0 : i32
    %c0_i32_0 = arith.constant 0 : i32
    %c0_i32_1 = arith.constant 0 : i32
    return %c0_i32, %c0_i32_0 : i32, i32
  }
  func.func @transform_2(%arg0: i32) -> (i32, i32) {
    %c0_i32 = arith.constant 0 : i32
    %c0_i32_0 = arith.constant 0 : i32
    %c0_i32_1 = arith.constant 0 : i32
    return %c0_i32, %c0_i32_0 : i32, i32
  }
  func.func @transform_3(%arg0: i32) -> (i32, i32) {
    %c0_i32 = arith.constant 0 : i32
    %c0_i32_0 = arith.constant 0 : i32
    %c0_i32_1 = arith.constant 0 : i32
    return %c0_i32, %c0_i32_0 : i32, i32
  }
  func.func @transform_4(%arg0: i32) -> (i32, i32, i32) {
    %c0_i32 = arith.constant 0 : i32
    %c0_i32_0 = arith.constant 0 : i32
    %c0_i32_1 = arith.constant 0 : i32
    return %arg0, %c0_i32, %c0_i32_0 : i32, i32, i32
  }
}

</mosaic_0001>

<bundles_post_ra>
// kernel: tpu_custom_call.1
= control target key start
LH: loop header
LB: loop body
LE: loop exit
PB: predicated region body
PF: predicated region fallthrough
CT: control target
= control target key end

     0   :  { %vm132_vm0 = vcmask 1041408   ;;  %s1726_s0 = inlined_call_operand.vmem [shape: f32[4,10,768], index: 0, kind: input, shape index: {}]   ;;  %s1727_s1 = inlined_call_operand.vmem [shape: f32[10,768], index: 1, kind: input, shape index: {}]   ;;  %s1728_s2 = inlined_call_operand.vmem [shape: f32[1,768], index: 2, kind: input, shape index: {}]   ;;  %s1729_s3 = inlined_call_operand.vmem [shape: f32[1,768], index: 3, kind: input, shape index: {}]   ;;  %s1730_s4 = inlined_call_operand.vmem [shape: f32[4,10,768], index: 4, kind: output, shape index: {}]  }
   0x1   :  { %v29_v0 = vld [vmem:[%s1726_s0 + $0x60] sm:$0xff]  ;;  %v30_v1 = vld [vmem:[%s1726_s0 + $0x68] sm:$0xff]  ;;  %v31_v2 = vld [vmem:[%s1726_s0 + $0x70] sm:$0xff] }
   0x2   :  { %v32_v3 = vld [vmem:[%s1726_s0 + $0x78] sm:$0xff]  ;;  %v33_v4 = vld [vmem:[%s1726_s0 + $0x80] sm:$0xff]  ;;  %v739_v6 = vld [vmem:[%s1727_s1 + $0x8] sm:$0xff] }
   0x3   :  { %v734_v5 = vld [vmem:[%s1727_s1] sm:$0xff]  ;;  %v744_v7 = vld [vmem:[%s1727_s1 + $0x10] sm:$0xff]  ;;  %v34_v8 = vld [vmem:[%s1726_s0 + $0x88] sm:$0xff]  ;;  %v768_v13 = vadd.f32 %v739_v6, %v30_v1 }
   0x4   :  { %v752_v9 = vld [vmem:[%s1727_s1 + $0x18] sm:$0xff]  ;;  %v757_v10 = vld [vmem:[%s1727_s1 + $0x20] sm:$0xff]  ;;  %v762_v11 = vld [vmem:[%s1727_s1 + $0x28] sm:$0xff]  ;;  %v765_v12 = vadd.f32 %v734_v5, %v29_v0  ;;  %v771_v14 = vadd.f32 %v744_v7, %v31_v2 }
   0x5   :  { %v774_v15 = vadd.f32 %v752_v9, %v32_v3  ;;  %v17_v16 = vld [vmem:[%s1726_s0] sm:$0xff]  ;;  %v18_v17 = vld [vmem:[%s1726_s0 + $0x8] sm:$0xff]  ;;  %v19_v18 = vld [vmem:[%s1726_s0 + $0x10] sm:$0xff]  ;;  %v815_v29 = vadd.f32 %v757_v10, %v33_v4  ;;  %v833_v36 = vadd.f32 %v762_v11, %v34_v8 }
   0x6   :  { %v146_v19 = vadd.f32 %v768_v13, %v765_v12  ;;  %v20_v20 = vld [vmem:[%s1726_s0 + $0x18] sm:$0xff]  ;;  %v21_v21 = vld [vmem:[%s1726_s0 + $0x20] sm:$0xff]  ;;  %v22_v22 = vld [vmem:[%s1726_s0 + $0x28] sm:$0xff]  ;;  %v797_v23 = vadd.f32 %v734_v5, %v17_v16  ;;  %v800_v24 = vadd.f32 %v739_v6, %v18_v17  ;;  %v803_v25 = vadd.f32 %v744_v7, %v19_v18 }
   0x7   :  { %v47_v26 = vld [vmem:[%s1726_s0 + $0xf0] sm:$0x3]  ;;  %v48_v27 = vld [vmem:[%s1726_s0 + $0xf8] sm:$0x3]  ;;  %v49_v28 = vld [vmem:[%s1726_s0 + $0x100] sm:$0x3]  ;;  %v819_v31 = vadd.f32 %v752_v9, %v20_v20  ;;  %v836_v37 = vadd.f32 %v757_v10, %v21_v21  ;;  %v877_v48 = vadd.f32 %v762_v11, %v22_v22 }
   0x8   :  { %v147_v30 = vadd.f32 %v146_v19, %v771_v14  ;;  %v125_v32 = vadd.f32 %v800_v24, %v797_v23  ;;  %v50_v33 = vld [vmem:[%s1726_s0 + $0x108] sm:$0x3]  ;;  %v51_v34 = vld [vmem:[%s1726_s0 + $0x110] sm:$0x3]  ;;  %v52_v35 = vld [vmem:[%s1726_s0 + $0x118] sm:$0x3] }
   0x9   :  { %v841_v38 = vld [vmem:[%s1727_s1 + $0x30] sm:$0x3]  ;;  %v846_v39 = vld [vmem:[%s1727_s1 + $0x38] sm:$0x3]  ;;  %v851_v40 = vld [vmem:[%s1727_s1 + $0x40] sm:$0x3] }
   0xa   :  { %v148_v41 = vadd.f32 %v147_v30, %v774_v15  ;;  %v126_v42 = vadd.f32 %v125_v32, %v803_v25  ;;  %v858_v43 = vld [vmem:[%s1727_s1 + $0x48] sm:$0x3]  ;;  %v863_v44 = vld [vmem:[%s1727_s1 + $0x50] sm:$0x3]  ;;  %v868_v45 = vld [vmem:[%s1727_s1 + $0x58] sm:$0x3]  ;;  %v871_v46 = vadd.f32 %v841_v38, %v47_v26  ;;  %v874_v47 = vadd.f32 %v846_v39, %v48_v27 }
   0xb   :  { %v880_v49 = vadd.f32 %v851_v40, %v49_v28  ;;  %v883_v50 = vadd.f32 %v858_v43, %v50_v33  ;;  %v886_v51 = vadd.f32 %v863_v44, %v51_v34  ;;  %v23_v52 = vld [vmem:[%s1726_s0 + $0x30] sm:$0x3]  ;;  %v24_v53 = vld [vmem:[%s1726_s0 + $0x38] sm:$0x3]  ;;  %v25_v58 = vld [vmem:[%s1726_s0 + $0x40] sm:$0x3]  ;;  %v907_v60 = vadd.f32 %v868_v45, %v52_v35 }
   0xc   :  { %v149_v54 = vadd.f32 %v148_v41, %v815_v29  ;;  %v127_v55 = vadd.f32 %v126_v42, %v819_v31  ;;  %v173_v56 = vsel %vm132_vm0, %v871_v46, 0.0  ;;  %v174_v57 = vsel %vm132_vm0, %v874_v47, 0.0  ;;  %v26_v59 = vld [vmem:[%s1726_s0 + $0x48] sm:$0x3]  ;;  %v27_v63 = vld [vmem:[%s1726_s0 + $0x50] sm:$0x3] }
   0xd   :  { %v175_v61 = vadd.f32 %v174_v57, %v173_v56  ;;  %v176_v62 = vsel %vm132_vm0, %v880_v49, 0.0  ;;  %v178_v2 = vsel %vm132_vm0, %v883_v50, 0.0  ;;  %v919_v3 = vadd.f32 %v841_v38, %v23_v52  ;;  %v28_v8 = vld [vmem:[%s1726_s0 + $0x58] sm:$0x3]  ;;  %v59_v19 = vld [vmem:[%s1726_s0 + $0x150] sm:$0x3] }
   0xe   :  { %v150_v0 = vadd.f32 %v149_v54, %v833_v36  ;;  %v128_v1 = vadd.f32 %v127_v55, %v836_v37  ;;  %v925_v16 = vadd.f32 %v846_v39, %v24_v53  ;;  %v928_v17 = vadd.f32 %v851_v40, %v25_v58  ;;  %v60_v20 = vld [vmem:[%s1726_s0 + $0x158] sm:$0x3]  ;;  %v61_v28 = vld [vmem:[%s1726_s0 + $0x160] sm:$0x3]  ;;  %v62_v30 = vld [vmem:[%s1726_s0 + $0x168] sm:$0x3] }
   0xf   :  { %v177_v4 = vadd.f32 %v176_v62, %v175_v61  ;;  %v931_v18 = vadd.f32 %v858_v43, %v26_v59  ;;  %v180_v22 = vsel %vm132_vm0, %v886_v51, 0.0  ;;  %v943_v26 = vadd.f32 %v863_v44, %v27_v63  ;;  %v63_v41 = vld [vmem:[%s1726_s0 + $0x170] sm:$0x3]  ;;  %v64_v54 = vld [vmem:[%s1726_s0 + $0x178] sm:$0x3] }
  0x10   :  { %151 = vadd.xlane.f32.xlu1 %v150_v0  ;;  %v129_v21 = vadd.f32 %v128_v1, %v877_v48  ;;  %v133_v27 = vsel %vm132_vm0, %v919_v3, 0.0  ;;  %v182_v33 = vsel %vm132_vm0, %v907_v60, 0.0  ;;  %v134_v34 = vsel %vm132_vm0, %v925_v16, 0.0  ;;  %v35_v61 = vld [vmem:[%s1726_s0 + $0x90] sm:$0x3] }
  0x11   :  { %v179_v32 = vadd.f32 %v178_v2, %v177_v4  ;;  %v136_v35 = vsel %vm132_vm0, %v928_v17, 0.0  ;;  %v963_v42 = vadd.f32 %v868_v45, %v28_v8  ;;  %v135_v52 = vadd.f32 %v134_v34, %v133_v27  ;;  %v36_v62 = vld [vmem:[%s1726_s0 + $0x98] sm:$0x3]  ;;  %v37_v4 = vld [vmem:[%s1726_s0 + $0xa0] sm:$0x3] }
  0x12   :  { %130 = vadd.xlane.f32.xlu0 %v129_v21  ;;  %v138_v53 = vsel %vm132_vm0, %v931_v18, 0.0  ;;  %v971_v55 = vadd.f32 %v841_v38, %v59_v19  ;;  %v974_v57 = vadd.f32 %v846_v39, %v60_v20  ;;  %v977_v58 = vadd.f32 %v851_v40, %v61_v28  ;;  %v38_v8 = vld [vmem:[%s1726_s0 + $0xa8] sm:$0x3]  ;;  %v39_v27 = vld [vmem:[%s1726_s0 + $0xb0] sm:$0x3] }
  0x13   :  { %v181_v56 = vadd.f32 %v180_v22, %v179_v32  ;;  %v980_v59 = vadd.f32 %v858_v43, %v62_v30  ;;  %v137_v63 = vadd.f32 %v136_v35, %v135_v52  ;;  %v140_v0 = vsel %vm132_vm0, %v943_v26, 0.0  ;;  %v40_v34 = vld [vmem:[%s1726_s0 + $0xb8] sm:$0x3] }
  0x14   :  { %v991_v1 = vadd.f32 %v863_v44, %v63_v41  ;;  %v193_v2 = vsel %vm132_vm0, %v971_v55, 0.0  ;;  %v1002_v20 = vadd.f32 %v868_v45, %v64_v54  ;;  %v194_v21 = vsel %vm132_vm0, %v974_v57, 0.0 }
  0x15   :  { %v183_v19 = vadd.f32 %v182_v33, %v181_v56  ;;  %v196_v22 = vsel %vm132_vm0, %v977_v58, 0.0  ;;  %v139_v28 = vadd.f32 %v138_v53, %v137_v63  ;;  %v142_v30 = vsel %vm132_vm0, %v963_v42, 0.0 }
  0x16   :  { %1743 = vst [vmem:[#allocation2_spill] sm:$0xff] %v1002_v20  ;;  %v195_v32 = vadd.f32 %v194_v21, %v193_v2  ;;  %v198_v33 = vsel %vm132_vm0, %v980_v59, 0.0  ;;  %v1019_v35 = vadd.f32 %v841_v38, %v35_v61  ;;  %v1022_v41 = vadd.f32 %v846_v39, %v36_v62  ;;  %v53_v38 = vld [vmem:[%s1726_s0 + $0x120] sm:$0xff]  ;;  %v54_v39 = vld [vmem:[%s1726_s0 + $0x128] sm:$0xff]  ;;  %v56_v21 = vld [vmem:[%s1726_s0 + $0x138] sm:$0xff] }
  0x17   :  { %184 = vadd.xlane.f32.xlu1 %v183_v19  ;;  %v1025_v52 = vadd.f32 %v851_v40, %v37_v4  ;;  %v1028_v53 = vadd.f32 %v858_v43, %v38_v8  ;;  %v141_v54 = vadd.f32 %v140_v0, %v139_v28  ;;  %v200_v63 = vsel %vm132_vm0, %v991_v1, 0.0  ;;  %v55_v40 = vld [vmem:[%s1726_s0 + $0x130] sm:$0xff] }
  0x18   :  { %v197_v56 = vadd.f32 %v196_v22, %v195_v32  ;;  %v1033_v2 = vadd.f32 %v863_v44, %v39_v27  ;;  %v202_v43 = vsel %vm132_vm0, %v1002_v20, 0.0  ;;  %v153_v61 = vsel %vm132_vm0, %v1019_v35, 0.0  ;;  %v41_v22 = vld [vmem:[%s1726_s0 + $0xc0] sm:$0xff]  ;;  %v42_v27 = vld [vmem:[%s1726_s0 + $0xc8] sm:$0xff] }
  0x19   :  { %v154_v44 = vsel %vm132_vm0, %v1022_v41, 0.0  ;;  %v156_v62 = vsel %vm132_vm0, %v1025_v52, 0.0  ;;  %v143_v0 = vadd.f32 %v142_v30, %v141_v54  ;;  %v1053_v8 = vadd.f32 %v868_v45, %v40_v34 }
  0x1a   :  { %v199_v4 = vadd.f32 %v198_v33, %v197_v56  ;;  %v155_v19 = vadd.f32 %v154_v44, %v153_v61  ;;  %v158_v28 = vsel %vm132_vm0, %v1028_v53, 0.0  ;;  %v1067_v30 = vadd.f32 %v734_v5, %v53_v38  ;;  %v43_v33 = vld [vmem:[%s1726_s0 + $0xd0] sm:$0xff]  ;;  %v57_v38 = vld [vmem:[%s1726_s0 + $0x140] sm:$0xff] }
  0x1b   :  { %v1070_v45 = vadd.f32 %v739_v6, %v54_v39  ;;  %v1073_v32 = vadd.f32 %v744_v7, %v55_v40  ;;  %144 = vadd.xlane.f32.xlu0 %v143_v0  ;;  %v160_v56 = vsel %vm132_vm0, %v1033_v2, 0.0  ;;  %v44_v39 = vld [vmem:[%s1726_s0 + $0xd8] sm:$0xff]  ;;  %v1087_v40 = vadd.f32 %v752_v9, %v56_v21  ;;  %v45_v21 = vld [vmem:[%s1726_s0 + $0xe0] sm:$0xff] }
  0x1c   :  { %v201_v34 = vadd.f32 %v200_v63, %v199_v4  ;;  %v157_v54 = vadd.f32 %v156_v62, %v155_v19  ;;  %v1092_v63 = vadd.f32 %v734_v5, %v41_v22  ;;  %v1095_v44 = vadd.f32 %v739_v6, %v42_v27  ;;  %v58_v19 = vld [vmem:[%s1726_s0 + $0x148] sm:$0xff] }
  0x1d   :  { %v186_v61 = vadd.f32 %v1070_v45, %v1067_v30  ;;  %v162_v4 = vsel %vm132_vm0, %v1053_v8, 0.0  ;;  %v1106_v20 = vadd.f32 %v744_v7, %v43_v33  ;;  %v1109_v5 = vadd.f32 %v757_v10, %v57_v38 }
  0x1e   :  { %v203_v62 = vadd.f32 %v202_v43, %v201_v34  ;;  %v159_v0 = vadd.f32 %v158_v28, %v157_v54  ;;  %v1113_v43 = vadd.f32 %v752_v9, %v44_v39  ;;  %v166_v22 = vadd.f32 %v1095_v44, %v1092_v63  ;;  %v46_v28 = vld [vmem:[%s1726_s0 + $0xe8] sm:$0xff] }
  0x1f   :  { %v187_v6 = vadd.f32 %v186_v61, %v1073_v32  ;;  %v1121_v7 = vadd.f32 %v762_v11, %v58_v19  ;;  %v1125_v34 = vadd.f32 %v757_v10, %v45_v21  ;;  %v1130_v39 = vadd.f32 %v762_v11, %v46_v28 }
  0x20   :  { %204 = vadd.xlane.f32.xlu1 %v203_v62  ;;  %v161_v27 = vadd.f32 %v160_v56, %v159_v0  ;;  %v167_v9 = vadd.f32 %v166_v22, %v1106_v20 }
  0x21   :  { %v188_v33 = vadd.f32 %v187_v6, %v1087_v40 }
  0x22   :  { %v163_v54 = vadd.f32 %v162_v4, %v161_v27  ;;  %v168_v56 = vadd.f32 %v167_v9, %v1113_v43 }
  0x23   :  { %v189_v38 = vadd.f32 %v188_v33, %v1109_v5 }
  0x24   :  { %164 = vadd.xlane.f32.xlu0 %v163_v54  ;;  %v169_v62 = vadd.f32 %v168_v56, %v1125_v34 }
  0x25   :  { %v190_v61 = vadd.f32 %v189_v38, %v1121_v7 }
  0x26   :  { %v170_v0 = vadd.f32 %v169_v62, %v1130_v39 }
  0x27   :  { %191 = vadd.xlane.f32.xlu1 %v190_v61 }
  0x28   :  { %171 = vadd.xlane.f32.xlu0 %v170_v0 }
  0x9d   :  { %v152_v10 = vpop.xlane.xlu1 %151 }
  0x9e   :  { %v209_v19 = vmul.f32 0.0013020834, %v152_v10 }
  0x9f   :  { %v131_v21 = vpop.xlane.xlu0 %130 }
  0xa0   :  { %v207_v4 = vmul.f32 0.0013020834, %v131_v21  ;;  %v1137_v6 = vsub.f32 %v765_v12, %v209_v19  ;;  %v1140_v11 = vsub.f32 %v768_v13, %v209_v19  ;;  %v1143_v22 = vsub.f32 %v771_v14, %v209_v19 }
  0xa1   :  { %v1146_v27 = vsub.f32 %v774_v15, %v209_v19  ;;  %v1180_v56 = vsub.f32 %v833_v36, %v209_v19 }
  0xa2   :  { %1744 = vst [vmem:[#allocation3_spill] sm:$0xff] %v1143_v22  ;;  %v1149_v28 = vsub.f32 %v797_v23, %v207_v4  ;;  %v1152_v33 = vsub.f32 %v800_v24, %v207_v4  ;;  %v1155_v9 = vsub.f32 %v803_v25, %v207_v4  ;;  %v1158_v12 = vsub.f32 %v819_v31, %v207_v4 }
  0xa3   :  { %1745 = vst [vmem:[#allocation4_spill] sm:$0xff] %v1146_v27  ;;  %v1161_v13 = vsub.f32 %v836_v37, %v207_v4  ;;  %v275_v14 = vmul.f32 %v1137_v6, %v1137_v6  ;;  %v276_v15 = vmul.f32 %v1140_v11, %v1140_v11  ;;  %v1168_v54 = vsub.f32 %v877_v48, %v207_v4 }
  0xa4   :  { %v185_v23 = vpop.xlane.xlu1 %184  ;;  %v263_v24 = vmul.f32 %v1149_v28, %v1149_v28  ;;  %v264_v25 = vmul.f32 %v1152_v33, %v1152_v33  ;;  %v1175_v31 = vsub.f32 %v815_v29, %v209_v19  ;;  %v265_v38 = vmul.f32 %v1155_v9, %v1155_v9 }
  0xa5   :  { %v212_v37 = vmul.f32 0.0013020834, %v185_v23  ;;  %v277_v48 = vmul.f32 %v1143_v22, %v1143_v22  ;;  %v266_v61 = vmul.f32 %v1158_v12, %v1158_v12  ;;  %v267_v62 = vmul.f32 %v1161_v13, %v1161_v13 }
  0xa6   :  { %1746 = vst [vmem:[#allocation5_spill] sm:$0xff] %v1175_v31  ;;  %v311_v0 = vadd.f32 %v264_v25, %v263_v24  ;;  %v278_v29 = vmul.f32 %v1146_v27, %v1146_v27  ;;  %v331_v10 = vadd.f32 %v276_v15, %v275_v14  ;;  %v268_v4 = vmul.f32 %v1168_v54, %v1168_v54 }
  0xa7   :  { %v1191_v21 = vsub.f32 %v871_v46, %v212_v37  ;;  %v1194_v36 = vsub.f32 %v874_v47, %v212_v37  ;;  %v1197_v19 = vsub.f32 %v880_v49, %v212_v37  ;;  %v279_v24 = vmul.f32 %v1175_v31, %v1175_v31 }
  0xa8   :  { %v312_v23 = vadd.f32 %v311_v0, %v265_v38  ;;  %v1204_v25 = vsub.f32 %v883_v50, %v212_v37  ;;  %v145_v14 = vpop.xlane.xlu0 %144  ;;  %v280_v46 = vmul.f32 %v1180_v56, %v1180_v56  ;;  %v332_v15 = vadd.f32 %v331_v10, %v277_v48 }
  0xa9   :  { %1747 = vst [vmem:[#allocation6_spill] sm:$0xff] %v1191_v21  ;;  %1748 = vst [vmem:[#allocation7_spill] sm:$0xff] %v1194_v36  ;;  %v1209_v47 = vsub.f32 %v886_v51, %v212_v37  ;;  %v293_v49 = vmul.f32 %v1191_v21, %v1191_v21  ;;  %v208_v27 = vmul.f32 0.0013020834, %v145_v14  ;;  %v1214_v38 = vsub.f32 %v907_v60, %v212_v37 }
  0xaa   :  { %1749 = vst [vmem:[#allocation8_spill] sm:$0xff] %v1197_v19  ;;  %1750 = vst [vmem:[#allocation9_spill] sm:$0xff] %v1204_v25  ;;  %v313_v22 = vadd.f32 %v312_v23, %v266_v61  ;;  %v294_v50 = vmul.f32 %v1194_v36, %v1194_v36  ;;  %v333_v0 = vadd.f32 %v332_v15, %v278_v29 }
  0xab   :  { %1751 = vst [vmem:[#allocation10_spill] sm:$0xff] %v1209_v47  ;;  %1752 = vst [vmem:[#allocation11_spill] sm:$0xff] %v1214_v38  ;;  %v295_v31 = vmul.f32 %v1197_v19, %v1197_v19  ;;  %v296_v48 = vmul.f32 %v1204_v25, %v1204_v25  ;;  %v358_v51 = vsel %vm132_vm0, %v293_v49, 0.0  ;;  %v1224_v21 = vsub.f32 %v919_v3, %v208_v27 }
  0xac   :  { %v314_v10 = vadd.f32 %v313_v22, %v267_v62  ;;  %v1227_v61 = vsub.f32 %v925_v16, %v208_v27  ;;  %v1230_v60 = vsub.f32 %v928_v17, %v208_v27  ;;  %v334_v37 = vadd.f32 %v333_v0, %v279_v24 }
  0xad   :  { %v1233_v29 = vsub.f32 %v931_v18, %v208_v27  ;;  %v1236_v23 = vsub.f32 %v943_v26, %v208_v27  ;;  %v1239_v14 = vsub.f32 %v963_v42, %v208_v27  ;;  %v205_v22 = vpop.xlane.xlu1 %204  ;;  %v269_v3 = vmul.f32 %v1224_v21, %v1224_v21 }
  0xae   :  { %v315_v62 = vadd.f32 %v314_v10, %v268_v4  ;;  %v270_v16 = vmul.f32 %v1227_v61, %v1227_v61  ;;  %v359_v17 = vsel %vm132_vm0, %v294_v50, 0.0  ;;  %v271_v18 = vmul.f32 %v1230_v60, %v1230_v60 }
  0xaf   :  { %1753 = vst [vmem:[#allocation12_spill] sm:$0xff] %v1236_v23  ;;  %1754 = vst [vmem:[#allocation13_spill] sm:$0xff] %v1239_v14  ;;  %v272_v26 = vmul.f32 %v1233_v29, %v1233_v29  ;;  %v273_v42 = vmul.f32 %v1236_v23, %v1236_v23  ;;  %v297_v27 = vmul.f32 %v1209_v47, %v1209_v47  ;;  %v318_v24 = vsel %vm132_vm0, %v269_v3, 0.0 }
  0xb0   :  { %316 = vadd.xlane.f32.xlu0 %v315_v62  ;;  %v274_v4 = vmul.f32 %v1239_v14, %v1239_v14  ;;  %v319_v15 = vsel %vm132_vm0, %v270_v16, 0.0  ;;  %v298_v49 = vmul.f32 %v1214_v38, %v1214_v38  ;;  %v1260_v50 = vmul.f32 0.0013020834, %v205_v22 }
  0xb1   :  { %v165_v0 = vpop.xlane.xlu0 %164  ;;  %v335_v10 = vadd.f32 %v334_v37, %v280_v46  ;;  %v320_v25 = vadd.f32 %v319_v15, %v318_v24  ;;  %v360_v19 = vadd.f32 %v359_v17, %v358_v51  ;;  %v321_v47 = vsel %vm132_vm0, %v271_v18, 0.0 }
  0xb2   :  { %v210_v36 = vmul.f32 0.0013020834, %v165_v0  ;;  %v323_v62 = vsel %vm132_vm0, %v272_v26, 0.0  ;;  %v361_v14 = vsel %vm132_vm0, %v295_v31, 0.0  ;;  %v325_v3 = vsel %vm132_vm0, %v273_v42, 0.0 }
  0xb3   :  { %v322_v23 = vadd.f32 %v321_v47, %v320_v25  ;;  %v327_v16 = vsel %vm132_vm0, %v274_v4, 0.0  ;;  %v363_v38 = vsel %vm132_vm0, %v296_v48, 0.0  ;;  %v362_v17 = vadd.f32 %v361_v14, %v360_v19 }
  0xb4   :  { %336 = vadd.xlane.f32.xlu0 %v335_v10  ;;  %v1269_v22 = vsub.f32 %v1019_v35, %v210_v36  ;;  %v1272_v46 = vsub.f32 %v1022_v41, %v210_v36  ;;  %v1275_v51 = vsub.f32 %v1025_v52, %v210_v36  ;;  %v1278_v37 = vsub.f32 %v1028_v53, %v210_v36  ;;  %v192_v31 = vpop.xlane.xlu1 %191 }
  0xb5   :  { %v324_v25 = vadd.f32 %v323_v62, %v322_v23  ;;  %v1281_v47 = vsub.f32 %v1033_v2, %v210_v36  ;;  %v1284_v48 = vsub.f32 %v1053_v8, %v210_v36  ;;  %v172_v35 = vpop.xlane.xlu0 %171  ;;  %v365_v18 = vsel %vm132_vm0, %v297_v27, 0.0 }
  0xb6   :  { %v281_v41 = vmul.f32 %v1269_v22, %v1269_v22  ;;  %v282_v52 = vmul.f32 %v1272_v46, %v1272_v46  ;;  %v283_v53 = vmul.f32 %v1275_v51, %v1275_v51  ;;  %v211_v23 = vmul.f32 0.0013020834, %v172_v35 }
  0xb7   :  { %v326_v26 = vadd.f32 %v325_v3, %v324_v25  ;;  %v284_v2 = vmul.f32 %v1278_v37, %v1278_v37  ;;  %v367_v8 = vsel %vm132_vm0, %v298_v49, 0.0  ;;  %v213_v36 = vmul.f32 0.0013020834, %v192_v31 }
  0xb8   :  { %v285_v19 = vmul.f32 %v1281_v47, %v1281_v47  ;;  %v338_v14 = vsel %vm132_vm0, %v281_v41, 0.0  ;;  %v339_v42 = vsel %vm132_vm0, %v282_v52, 0.0  ;;  %v286_v24 = vmul.f32 %v1284_v48, %v1284_v48 }
  0xb9   :  { %v328_v4 = vadd.f32 %v327_v16, %v326_v26  ;;  %v340_v27 = vadd.f32 %v339_v42, %v338_v14  ;;  %v341_v15 = vsel %vm132_vm0, %v283_v53, 0.0  ;;  %v1304_v0 = vsub.f32 %v1092_v63, %v211_v23 }
  0xba   :  { %v1307_v49 = vsub.f32 %v1095_v44, %v211_v23  ;;  %v1310_v10 = vsub.f32 %v1106_v20, %v211_v23  ;;  %v1313_v62 = vsub.f32 %v1113_v43, %v211_v23  ;;  %v343_v16 = vsel %vm132_vm0, %v284_v2, 0.0 }
  0xbb   :  { %329 = vadd.xlane.f32.xlu1 %v328_v4  ;;  %v342_v3 = vadd.f32 %v341_v15, %v340_v27  ;;  %v1317_v31 = vsub.f32 %v1125_v34, %v211_v23  ;;  %v1320_v25 = vsub.f32 %v1130_v39, %v211_v23  ;;  %v345_v63 = vsel %vm132_vm0, %v285_v19, 0.0 }
  0xbc   :  { %v287_v44 = vmul.f32 %v1304_v0, %v1304_v0  ;;  %v288_v20 = vmul.f32 %v1307_v49, %v1307_v49  ;;  %v289_v43 = vmul.f32 %v1310_v10, %v1310_v10  ;;  %v347_v41 = vsel %vm132_vm0, %v286_v24, 0.0 }
  0xbd   :  { %v344_v35 = vadd.f32 %v343_v16, %v342_v3  ;;  %v290_v34 = vmul.f32 %v1313_v62, %v1313_v62  ;;  %v364_v52 = vadd.f32 %v363_v38, %v362_v17  ;;  %v1333_v53 = vsub.f32 %v1067_v30, %v213_v36 }
  0xbe   :  { %v351_v39 = vadd.f32 %v288_v20, %v287_v44  ;;  %v1336_v23 = vsub.f32 %v1070_v45, %v213_v36  ;;  %v1339_v26 = vsub.f32 %v1073_v32, %v213_v36  ;;  %v291_v19 = vmul.f32 %v1317_v31, %v1317_v31 }
  0xbf   :  { %v346_v2 = vadd.f32 %v345_v63, %v344_v35  ;;  %v292_v14 = vmul.f32 %v1320_v25, %v1320_v25  ;;  %v1346_v42 = vsub.f32 %v1087_v40, %v213_v36  ;;  %v1349_v30 = vsub.f32 %v1109_v5, %v213_v36 }
  0xc0   :  { %v352_v38 = vadd.f32 %v351_v39, %v289_v43  ;;  %v299_v45 = vmul.f32 %v1333_v53, %v1333_v53  ;;  %v300_v32 = vmul.f32 %v1336_v23, %v1336_v23  ;;  %v366_v4 = vadd.f32 %v365_v18, %v364_v52 }
  0xc1   :  { %v348_v17 = vadd.f32 %v347_v41, %v346_v2  ;;  %v1356_v24 = vsub.f32 %v1121_v7, %v213_v36  ;;  %v301_v27 = vmul.f32 %v1339_v26, %v1339_v26  ;;  %v302_v15 = vmul.f32 %v1346_v42, %v1346_v42 }
  0xc2   :  { %v353_v40 = vadd.f32 %v352_v38, %v290_v34  ;;  %v371_v5 = vadd.f32 %v300_v32, %v299_v45  ;;  %v1364_v3 = vsub.f32 %v971_v55, %v1260_v50  ;;  %v1368_v16 = vsub.f32 %v974_v57, %v1260_v50  ;;  %v1755_v34 = vld [vmem:[#allocation2_spill] sm:$0xff] }
  0xc3   :  { %349 = vadd.xlane.f32.xlu1 %v348_v17  ;;  %v1372_v7 = vsub.f32 %v977_v58, %v1260_v50  ;;  %v1376_v18 = vsub.f32 %v980_v59, %v1260_v50  ;;  %v1380_v36 = vsub.f32 %v991_v1, %v1260_v50  ;;  %v303_v55 = vmul.f32 %v1349_v30, %v1349_v30 }
  0xc4   :  { %v354_v63 = vadd.f32 %v353_v40, %v291_v19  ;;  %v372_v44 = vadd.f32 %v371_v5, %v301_v27  ;;  %v305_v57 = vmul.f32 %v1364_v3, %v1364_v3  ;;  %v368_v20 = vadd.f32 %v367_v8, %v366_v4 }
  0xc5   :  { %v306_v58 = vmul.f32 %v1368_v16, %v1368_v16  ;;  %v307_v59 = vmul.f32 %v1372_v7, %v1372_v7  ;;  %v308_v43 = vmul.f32 %v1376_v18, %v1376_v18  ;;  %v1395_v52 = vsub.f32 %v1755_v34, %v1260_v50 }
  0xc6   :  { %v355_v1 = vadd.f32 %v354_v63, %v292_v14  ;;  %v373_v35 = vadd.f32 %v372_v44, %v302_v15  ;;  %v378_v41 = vsel %vm132_vm0, %v305_v57, 0.0  ;;  %v309_v8 = vmul.f32 %v1380_v36, %v1380_v36 }
  0xc7   :  { %369 = vadd.xlane.f32.xlu1 %v368_v20  ;;  %v379_v39 = vsel %vm132_vm0, %v306_v58, 0.0  ;;  %v381_v2 = vsel %vm132_vm0, %v307_v59, 0.0  ;;  %v304_v19 = vmul.f32 %v1356_v24, %v1356_v24  ;;  %v383_v45 = vsel %vm132_vm0, %v308_v43, 0.0 }
  0xc8   :  { %356 = vadd.xlane.f32.xlu0 %v355_v1  ;;  %v374_v14 = vadd.f32 %v373_v35, %v303_v55  ;;  %v380_v38 = vadd.f32 %v379_v39, %v378_v41  ;;  %v310_v50 = vmul.f32 %v1395_v52, %v1395_v52  ;;  %v385_v4 = vsel %vm132_vm0, %v309_v8, 0.0  ;;  %v463_v8 = vld [vmem:[%s1728_s2] sm:$0x3f] }
  0xc9   :  { %v466_v63 = vlaneseq }
  0xca   :  { %v375_v32 = vadd.f32 %v374_v14, %v304_v19  ;;  %v382_v17 = vadd.f32 %v381_v2, %v380_v38  ;;  %v387_v15 = vsel %vm132_vm0, %v310_v50, 0.0  ;;  %v464_v19 = vld [vmem:[%s1729_s3] sm:$0x3f] }
  0xcb   :  { %v467_v20 = vshrl.u32 %v466_v63, 7 }
  0xcc   :  { %376 = vadd.xlane.f32.xlu0 %v375_v32  ;;  %v384_v27 = vadd.f32 %v383_v45, %v382_v17 }
  0xcd   :  { %v468_v1 = vsub.s32 0, %v467_v20  ;;  %v472_v35 = vsub.s32 1, %v467_v20  ;;  %v476_v41 = vsub.s32 2, %v467_v20  ;;  %v480_v34 = vsub.s32 3, %v467_v20 }
  0xce   :  { %v386_v40 = vadd.f32 %v385_v4, %v384_v27  ;;  %v484_v39 = vsub.s32 4, %v467_v20  ;;  %v488_v2 = vsub.s32 5, %v467_v20 }
  0xcf   :  { %v1414_v45 = vrot.slane %v463_v8, %v468_v1  ;;  %v1416_v32 = vrot.slane %v463_v8, %v472_v35  ;;  %v1418_v17 = vrot.slane %v463_v8, %v476_v41  ;;  %v1420_v50 = vrot.slane %v463_v8, %v480_v34 }
  0xd0   :  { %v388_v5 = vadd.f32 %v387_v15, %v386_v40  ;;  %v1422_v4 = vrot.slane %v463_v8, %v484_v39  ;;  %v1424_v27 = vrot.slane %v463_v8, %v488_v2  ;;  %v1426_v40 = vrot.slane %v464_v19, %v468_v1 }
  0xd1   :  { %v1428_v63 = vrot.slane %v464_v19, %v472_v35  ;;  %v1440_v1 = vrot.slane %v464_v19, %v488_v2 }
  0xd2   :  { %389 = vadd.xlane.f32.xlu1 %v388_v5 }
 0x13d   :  { %v317_v44 = vpop.xlane.xlu0 %316 }
 0x13e   :  { %v391_v55 = vmul.f32 0.0013020834, %v317_v44  ;;  %v1430_v44 = vrot.slane %v464_v19, %v476_v41 }
 0x140   :  { %v399_v57 = vadd.f32 1e-12, %v391_v55  ;;  %v1432_v55 = vrot.slane %v464_v19, %v480_v34 }
 0x141   :  { %v337_v58 = vpop.xlane.xlu0 %336 }
 0x142   :  { %675 = vrsqrt.f32 %v399_v57  ;;  %v393_v59 = vmul.f32 0.0013020834, %v337_v58  ;;  %v1434_v57 = vrot.slane %v464_v19, %v484_v39 }
 0x144   :  { %v401_v43 = vadd.f32 1e-12, %v393_v59 }
 0x146   :  { %677 = vrsqrt.f32 %v401_v43 }
 0x148   :  { %v330_v14 = vpop.xlane.xlu1 %329 }
 0x149   :  { %v392_v38 = vmul.f32 0.0013020834, %v330_v14 }
 0x14b   :  { %v400_v15 = vadd.f32 1e-12, %v392_v38 }
 0x14c   :  { %v676_v5 = vpop.eup %675 }
 0x14d   :  { %v415_v20 = vmul.f32 %v676_v5, %v1149_v28  ;;  %v416_v58 = vmul.f32 %v676_v5, %v1152_v33  ;;  %v417_v59 = vmul.f32 %v676_v5, %v1155_v9  ;;  %v418_v43 = vmul.f32 %v676_v5, %v1158_v12 }
 0x14e   :  { %v419_v8 = vmul.f32 %v676_v5, %v1161_v13  ;;  %v420_v35 = vmul.f32 %v676_v5, %v1168_v54  ;;  %679 = vrsqrt.f32 %v400_v15 }
 0x14f   :  { %v496_v41 = vmul.f32 %v1414_v45, %v415_v20  ;;  %v497_v34 = vmul.f32 %v1416_v32, %v416_v58  ;;  %v498_v39 = vmul.f32 %v1418_v17, %v417_v59  ;;  %v499_v28 = vmul.f32 %v1420_v50, %v418_v43  ;;  %v1756_v58 = vld [vmem:[#allocation3_spill] sm:$0xff]  ;;  %v1757_v59 = vld [vmem:[#allocation4_spill] sm:$0xff]  ;;  %v1758_v43 = vld [vmem:[#allocation5_spill] sm:$0xff] }
 0x150   :  { %v678_v33 = vpop.eup %677  ;;  %v500_v9 = vmul.f32 %v1422_v4, %v419_v8  ;;  %v501_v12 = vmul.f32 %v1424_v27, %v420_v35  ;;  %v350_v2 = vpop.xlane.xlu1 %349 }
 0x151   :  { %v575_v19 = vadd.f32 %v1426_v40, %v496_v41  ;;  %v576_v13 = vadd.f32 %v1428_v63, %v497_v34  ;;  %v577_v54 = vadd.f32 %v1430_v44, %v498_v39  ;;  %v578_v14 = vadd.f32 %v1432_v55, %v499_v28 }
 0x152   :  { %v579_v38 = vadd.f32 %v1434_v57, %v500_v9  ;;  %v580_v15 = vadd.f32 %v1440_v1, %v501_v12  ;;  %v427_v5 = vmul.f32 %v678_v33, %v1137_v6  ;;  %v428_v20 = vmul.f32 %v678_v33, %v1140_v11 }
 0x153   :  { %623 = vst [vmem:[%s1730_s4] sm:$0xff] %v575_v19  ;;  %624 = vst [vmem:[%s1730_s4 + $0x8] sm:$0xff] %v576_v13  ;;  %v429_v6 = vmul.f32 %v678_v33, %v1756_v58  ;;  %v430_v11 = vmul.f32 %v678_v33, %v1757_v59  ;;  %v431_v8 = vmul.f32 %v678_v33, %v1758_v43  ;;  %v394_v39 = vmul.f32 0.0013020834, %v350_v2 }
 0x154   :  { %625 = vst [vmem:[%s1730_s4 + $0x10] sm:$0xff] %v577_v54  ;;  %626 = vst [vmem:[%s1730_s4 + $0x18] sm:$0xff] %v578_v14  ;;  %v432_v35 = vmul.f32 %v678_v33, %v1180_v56  ;;  %v508_v41 = vmul.f32 %v1414_v45, %v427_v5  ;;  %v509_v34 = vmul.f32 %v1416_v32, %v428_v20  ;;  %v370_v19 = vpop.xlane.xlu1 %369 }
 0x155   :  { %627 = vst [vmem:[%s1730_s4 + $0x20] sm:$0xff] %v579_v38  ;;  %628 = vst [vmem:[%s1730_s4 + $0x28] sm:$0xff] %v580_v15  ;;  %v510_v28 = vmul.f32 %v1418_v17, %v429_v6  ;;  %v511_v9 = vmul.f32 %v1420_v50, %v430_v11  ;;  %v512_v12 = vmul.f32 %v1422_v4, %v431_v8  ;;  %v357_v33 = vpop.xlane.xlu0 %356  ;;  %v402_v14 = vadd.f32 1e-12, %v394_v39 }
 0x156   :  { %v513_v56 = vmul.f32 %v1424_v27, %v432_v35  ;;  %v587_v13 = vadd.f32 %v1426_v40, %v508_v41  ;;  %v588_v54 = vadd.f32 %v1428_v63, %v509_v34  ;;  %v395_v38 = vmul.f32 0.0013020834, %v357_v33  ;;  %v1759_v34 = vld [vmem:[#allocation12_spill] sm:$0xff] }
 0x157   :  { %v589_v15 = vadd.f32 %v1430_v44, %v510_v28  ;;  %v590_v2 = vadd.f32 %v1432_v55, %v511_v9  ;;  %v591_v5 = vadd.f32 %v1434_v57, %v512_v12  ;;  %681 = vrsqrt.f32 %v402_v14  ;;  %v1760_v28 = vld [vmem:[#allocation13_spill] sm:$0xff] }
 0x158   :  { %v592_v20 = vadd.f32 %v1440_v1, %v513_v56  ;;  %v680_v58 = vpop.eup %679  ;;  %635 = vst [vmem:[%s1730_s4 + $0x60] sm:$0xff] %v587_v13  ;;  %636 = vst [vmem:[%s1730_s4 + $0x68] sm:$0xff] %v588_v54  ;;  %v403_v6 = vadd.f32 1e-12, %v395_v38  ;;  %v396_v59 = vmul.f32 0.0013020834, %v370_v19 }
 0x159   :  { %637 = vst [vmem:[%s1730_s4 + $0x70] sm:$0xff] %v589_v15  ;;  %638 = vst [vmem:[%s1730_s4 + $0x78] sm:$0xff] %v590_v2  ;;  %v421_v11 = vmul.f32 %v680_v58, %v1224_v21  ;;  %v422_v43 = vmul.f32 %v680_v58, %v1227_v61  ;;  %v423_v8 = vmul.f32 %v680_v58, %v1230_v60  ;;  %v377_v41 = vpop.xlane.xlu0 %376 }
 0x15a   :  { %639 = vst [vmem:[%s1730_s4 + $0x80] sm:$0xff] %v591_v5  ;;  %640 = vst [vmem:[%s1730_s4 + $0x88] sm:$0xff] %v592_v20  ;;  %v424_v35 = vmul.f32 %v680_v58, %v1233_v29  ;;  %v425_v39 = vmul.f32 %v680_v58, %v1759_v34  ;;  %v426_v9 = vmul.f32 %v680_v58, %v1760_v28  ;;  %683 = vrsqrt.f32 %v403_v6 }
 0x15b   :  { %v404_v12 = vadd.f32 1e-12, %v396_v59  ;;  %v502_v56 = vmul.f32 %v1414_v45, %v421_v11  ;;  %v503_v33 = vmul.f32 %v1416_v32, %v422_v43  ;;  %v504_v19 = vmul.f32 %v1418_v17, %v423_v8 }
 0x15c   :  { %v505_v21 = vmul.f32 %v1420_v50, %v424_v35  ;;  %v506_v61 = vmul.f32 %v1422_v4, %v425_v39  ;;  %v507_v60 = vmul.f32 %v1424_v27, %v426_v9  ;;  %v397_v29 = vmul.f32 0.0013020834, %v377_v41 }
 0x15d   :  { %685 = vrsqrt.f32 %v404_v12  ;;  %v581_v13 = vadd.f32 %v1426_v40, %v502_v56  ;;  %v582_v54 = vadd.f32 %v1428_v63, %v503_v33  ;;  %v583_v14 = vadd.f32 %v1430_v44, %v504_v19 }
 0x15e   :  { %v584_v38 = vadd.f32 %v1432_v55, %v505_v21  ;;  %v585_v15 = vadd.f32 %v1434_v57, %v506_v61  ;;  %v586_v2 = vadd.f32 %v1440_v1, %v507_v60  ;;  %v405_v5 = vadd.f32 1e-12, %v397_v29 }
 0x15f   :  { %629 = vst [vmem:[%s1730_s4 + $0x30] sm:$0x3] %v581_v13  ;;  %630 = vst [vmem:[%s1730_s4 + $0x38] sm:$0x3] %v582_v54  ;;  %v390_v20 = vpop.xlane.xlu1 %389 }
 0x160   :  { %631 = vst [vmem:[%s1730_s4 + $0x40] sm:$0x3] %v583_v14  ;;  %632 = vst [vmem:[%s1730_s4 + $0x48] sm:$0x3] %v584_v38  ;;  %v398_v58 = vmul.f32 0.0013020834, %v390_v20  ;;  %687 = vrsqrt.f32 %v405_v5 }
 0x161   :  { %633 = vst [vmem:[%s1730_s4 + $0x50] sm:$0x3] %v585_v15  ;;  %634 = vst [vmem:[%s1730_s4 + $0x58] sm:$0x3] %v586_v2  ;;  %v682_v6 = vpop.eup %681  ;;  %v1761_v38 = vld [vmem:[#allocation6_spill] sm:$0xff]  ;;  %v1762_v15 = vld [vmem:[#allocation7_spill] sm:$0xff] }
 0x162   :  { %v406_v59 = vadd.f32 1e-12, %v398_v58  ;;  %v433_v11 = vmul.f32 %v682_v6, %v1269_v22  ;;  %v434_v43 = vmul.f32 %v682_v6, %v1272_v46  ;;  %v435_v8 = vmul.f32 %v682_v6, %v1275_v51 }
 0x163   :  { %v436_v35 = vmul.f32 %v682_v6, %v1278_v37  ;;  %v437_v34 = vmul.f32 %v682_v6, %v1281_v47  ;;  %v438_v39 = vmul.f32 %v682_v6, %v1284_v48 }
 0x164   :  { %v684_v41 = vpop.eup %683  ;;  %689 = vrsqrt.f32 %v406_v59  ;;  %v514_v28 = vmul.f32 %v1414_v45, %v433_v11  ;;  %v515_v9 = vmul.f32 %v1416_v32, %v434_v43  ;;  %v516_v12 = vmul.f32 %v1418_v17, %v435_v8  ;;  %v1763_v43 = vld [vmem:[#allocation8_spill] sm:$0xff] }
 0x165   :  { %v517_v22 = vmul.f32 %v1420_v50, %v436_v35  ;;  %v518_v46 = vmul.f32 %v1422_v4, %v437_v34  ;;  %v519_v51 = vmul.f32 %v1424_v27, %v438_v39  ;;  %v439_v37 = vmul.f32 %v684_v41, %v1304_v0  ;;  %v1764_v35 = vld [vmem:[#allocation9_spill] sm:$0xff] }
 0x166   :  { %v440_v47 = vmul.f32 %v684_v41, %v1307_v49  ;;  %v593_v48 = vadd.f32 %v1426_v40, %v514_v28  ;;  %v594_v33 = vadd.f32 %v1428_v63, %v515_v9  ;;  %v595_v19 = vadd.f32 %v1430_v44, %v516_v12  ;;  %v1765_v28 = vld [vmem:[#allocation10_spill] sm:$0xff]  ;;  %v1766_v12 = vld [vmem:[#allocation11_spill] sm:$0xff] }
 0x167   :  { %v686_v56 = vpop.eup %685  ;;  %v596_v21 = vadd.f32 %v1432_v55, %v517_v22  ;;  %v597_v61 = vadd.f32 %v1434_v57, %v518_v46  ;;  %v598_v60 = vadd.f32 %v1440_v1, %v519_v51  ;;  %v441_v29 = vmul.f32 %v684_v41, %v1310_v10 }
 0x168   :  { %v442_v13 = vmul.f32 %v684_v41, %v1313_v62  ;;  %641 = vst [vmem:[%s1730_s4 + $0x90] sm:$0x3] %v593_v48  ;;  %642 = vst [vmem:[%s1730_s4 + $0x98] sm:$0x3] %v594_v33  ;;  %v443_v0 = vmul.f32 %v684_v41, %v1317_v31  ;;  %v444_v49 = vmul.f32 %v684_v41, %v1320_v25 }
 0x169   :  { %643 = vst [vmem:[%s1730_s4 + $0xa0] sm:$0x3] %v595_v19  ;;  %644 = vst [vmem:[%s1730_s4 + $0xa8] sm:$0x3] %v596_v21  ;;  %v520_v10 = vmul.f32 %v1414_v45, %v439_v37  ;;  %v521_v62 = vmul.f32 %v1416_v32, %v440_v47  ;;  %v522_v54 = vmul.f32 %v1418_v17, %v441_v29 }
 0x16a   :  { %645 = vst [vmem:[%s1730_s4 + $0xb0] sm:$0x3] %v597_v61  ;;  %646 = vst [vmem:[%s1730_s4 + $0xb8] sm:$0x3] %v598_v60  ;;  %v523_v14 = vmul.f32 %v1420_v50, %v442_v13  ;;  %v445_v31 = vmul.f32 %v686_v56, %v1761_v38  ;;  %v446_v25 = vmul.f32 %v686_v56, %v1762_v15  ;;  %v688_v6 = vpop.eup %687 }
 0x16b   :  { %v524_v2 = vmul.f32 %v1422_v4, %v443_v0  ;;  %v525_v5 = vmul.f32 %v1424_v27, %v444_v49  ;;  %v599_v20 = vadd.f32 %v1426_v40, %v520_v10  ;;  %v600_v58 = vadd.f32 %v1428_v63, %v521_v62 }
 0x16c   :  { %v601_v59 = vadd.f32 %v1430_v44, %v522_v54  ;;  %v602_v11 = vadd.f32 %v1432_v55, %v523_v14  ;;  %v447_v8 = vmul.f32 %v686_v56, %v1763_v43  ;;  %v448_v41 = vmul.f32 %v686_v56, %v1764_v35 }
 0x16d   :  { %v603_v34 = vadd.f32 %v1434_v57, %v524_v2  ;;  %v604_v39 = vadd.f32 %v1440_v1, %v525_v5  ;;  %647 = vst [vmem:[%s1730_s4 + $0xc0] sm:$0xff] %v599_v20  ;;  %648 = vst [vmem:[%s1730_s4 + $0xc8] sm:$0xff] %v600_v58  ;;  %v449_v9 = vmul.f32 %v686_v56, %v1765_v28 }
 0x16e   :  { %v450_v22 = vmul.f32 %v686_v56, %v1766_v12  ;;  %v690_v46 = vpop.eup %689  ;;  %649 = vst [vmem:[%s1730_s4 + $0xd0] sm:$0xff] %v601_v59  ;;  %650 = vst [vmem:[%s1730_s4 + $0xd8] sm:$0xff] %v602_v11  ;;  %v526_v51 = vmul.f32 %v1414_v45, %v445_v31  ;;  %v527_v37 = vmul.f32 %v1416_v32, %v446_v25 }
 0x16f   :  { %v528_v47 = vmul.f32 %v1418_v17, %v447_v8  ;;  %v529_v48 = vmul.f32 %v1420_v50, %v448_v41  ;;  %651 = vst [vmem:[%s1730_s4 + $0xe0] sm:$0xff] %v603_v34  ;;  %652 = vst [vmem:[%s1730_s4 + $0xe8] sm:$0xff] %v604_v39  ;;  %v530_v56 = vmul.f32 %v1422_v4, %v449_v9 }
 0x170   :  { %v531_v33 = vmul.f32 %v1424_v27, %v450_v22  ;;  %v451_v19 = vmul.f32 %v688_v6, %v1333_v53  ;;  %v452_v21 = vmul.f32 %v688_v6, %v1336_v23  ;;  %v605_v61 = vadd.f32 %v1426_v40, %v526_v51 }
 0x171   :  { %v606_v60 = vadd.f32 %v1428_v63, %v527_v37  ;;  %v607_v29 = vadd.f32 %v1430_v44, %v528_v47  ;;  %v608_v13 = vadd.f32 %v1432_v55, %v529_v48  ;;  %v609_v0 = vadd.f32 %v1434_v57, %v530_v56 }
 0x172   :  { %v610_v49 = vadd.f32 %v1440_v1, %v531_v33  ;;  %v453_v10 = vmul.f32 %v688_v6, %v1339_v26  ;;  %v454_v62 = vmul.f32 %v688_v6, %v1346_v42  ;;  %653 = vst [vmem:[%s1730_s4 + $0xf0] sm:$0x3] %v605_v61  ;;  %v455_v53 = vmul.f32 %v688_v6, %v1349_v30 }
 0x173   :  { %654 = vst [vmem:[%s1730_s4 + $0xf8] sm:$0x3] %v606_v60  ;;  %655 = vst [vmem:[%s1730_s4 + $0x100] sm:$0x3] %v607_v29  ;;  %v456_v23 = vmul.f32 %v688_v6, %v1356_v24  ;;  %v532_v26 = vmul.f32 %v1414_v45, %v451_v19  ;;  %v533_v42 = vmul.f32 %v1416_v32, %v452_v21 }
 0x174   :  { %656 = vst [vmem:[%s1730_s4 + $0x108] sm:$0x3] %v608_v13  ;;  %657 = vst [vmem:[%s1730_s4 + $0x110] sm:$0x3] %v609_v0  ;;  %v534_v54 = vmul.f32 %v1418_v17, %v453_v10  ;;  %v535_v14 = vmul.f32 %v1420_v50, %v454_v62  ;;  %v457_v30 = vmul.f32 %v690_v46, %v1364_v3 }
 0x175   :  { %658 = vst [vmem:[%s1730_s4 + $0x118] sm:$0x3] %v610_v49  ;;  %v458_v24 = vmul.f32 %v690_v46, %v1368_v16  ;;  %v536_v38 = vmul.f32 %v1422_v4, %v455_v53  ;;  %v537_v31 = vmul.f32 %v1424_v27, %v456_v23  ;;  %v611_v15 = vadd.f32 %v1426_v40, %v532_v26 }
 0x176   :  { %v612_v25 = vadd.f32 %v1428_v63, %v533_v42  ;;  %v613_v2 = vadd.f32 %v1430_v44, %v534_v54  ;;  %v614_v5 = vadd.f32 %v1432_v55, %v535_v14  ;;  %v459_v20 = vmul.f32 %v690_v46, %v1372_v7 }
 0x177   :  { %v460_v58 = vmul.f32 %v690_v46, %v1376_v18  ;;  %v615_v3 = vadd.f32 %v1434_v57, %v536_v38  ;;  %v616_v16 = vadd.f32 %v1440_v1, %v537_v31  ;;  %659 = vst [vmem:[%s1730_s4 + $0x120] sm:$0xff] %v611_v15  ;;  %v461_v6 = vmul.f32 %v690_v46, %v1380_v36 }
 0x178   :  { %660 = vst [vmem:[%s1730_s4 + $0x128] sm:$0xff] %v612_v25  ;;  %v462_v59 = vmul.f32 %v690_v46, %v1395_v52  ;;  %661 = vst [vmem:[%s1730_s4 + $0x130] sm:$0xff] %v613_v2  ;;  %v538_v7 = vmul.f32 %v1414_v45, %v457_v30  ;;  %v539_v18 = vmul.f32 %v1416_v32, %v458_v24 }
 0x179   :  { %662 = vst [vmem:[%s1730_s4 + $0x138] sm:$0xff] %v614_v5  ;;  %v540_v11 = vmul.f32 %v1418_v17, %v459_v20  ;;  %v541_v43 = vmul.f32 %v1420_v50, %v460_v58  ;;  %663 = vst [vmem:[%s1730_s4 + $0x140] sm:$0xff] %v615_v3  ;;  %v542_v36 = vmul.f32 %v1422_v4, %v461_v6 }
 0x17a   :  { %664 = vst [vmem:[%s1730_s4 + $0x148] sm:$0xff] %v616_v16  ;;  %v543_v52 = vmul.f32 %v1424_v27, %v462_v59  ;;  %v617_v45 = vadd.f32 %v1426_v40, %v538_v7  ;;  %v618_v32 = vadd.f32 %v1428_v63, %v539_v18 }
 0x17b   :  { %v619_v17 = vadd.f32 %v1430_v44, %v540_v11  ;;  %v620_v50 = vadd.f32 %v1432_v55, %v541_v43  ;;  %v621_v8 = vadd.f32 %v1434_v57, %v542_v36 }
 0x17c   :  { %v622_v35 = vadd.f32 %v1440_v1, %v543_v52  ;;  %665 = vst [vmem:[%s1730_s4 + $0x150] sm:$0x3] %v617_v45  ;;  %666 = vst [vmem:[%s1730_s4 + $0x158] sm:$0x3] %v618_v32 }
 0x17d   :  { %667 = vst [vmem:[%s1730_s4 + $0x160] sm:$0x3] %v619_v17  ;;  %668 = vst [vmem:[%s1730_s4 + $0x168] sm:$0x3] %v620_v50 }
 0x17e   :  { %669 = vst [vmem:[%s1730_s4 + $0x170] sm:$0x3] %v621_v8  ;;  %670 = vst [vmem:[%s1730_s4 + $0x178] sm:$0x3] %v622_v35 }

</bundles_post_ra>
